<compile_context>
chip_gen: v5e
topology: v5e:2x2
jax: 0.10.0
libtpu: 0.0.40
codegen_flags: <defaults>
</compile_context>

<pallas_src>
import math

import jax
import jax.numpy as jnp
from jax import lax
from jax.experimental import pallas as pl
from jax.experimental.pallas import tpu as pltpu


def _linear_kernel(x_ref, w_ref, b_ref, o_ref):
    """y = x @ W.T + b, stored directly in the PyTorch (batch, out) layout.

    x_ref : (TB, F_in)    activation tile, native dtype (no pre-cast)
    w_ref : (F_out, F_in) PyTorch nn.Linear weight layout (no transpose)
    b_ref : (F_out,)      bias scalars in SMEM
    o_ref : (TB, F_out)   output tile; F_out=2 -> masked store, but the whole
                          output is tiny so that penalty is noise vs. a launch.
    """
    # MXU matmul with f32 accumulation; operands stay in their stored dtype.
    y = lax.dot_general(
        x_ref[...], w_ref[...],
        dimension_numbers=(((1,), (1,)), ((), ())),   # contract feature axes
        preferred_element_type=jnp.float32,
    )
    # Single vectorized bias add built from the SMEM scalars + single store.
    col = lax.broadcasted_iota(jnp.int32, y.shape, 1)
    bias = jnp.zeros_like(y)
    for o in range(o_ref.shape[1]):                   # F_out == 2, static unroll
        bias = jnp.where(col == o, b_ref[o], bias)
    o_ref[...] = (y + bias).astype(o_ref.dtype)


def classifier_forward(res, weight, bias):
    """Mirror of Classifier.forward.

    res    : tuple/list whose first element is the (batch, 32) feature matrix
    weight : (2, 32) fc weight (PyTorch layout)
    bias   : (2,)    fc bias
    returns: (batch, 2), y = x @ W.T + b  (same dtype as x)
    """
    x = res[0]                                        # res = res[0]
    batch, f_in = x.shape
    f_out, f_in_w = weight.shape
    assert f_in == f_in_w

    # ---- grid / tile sizing -------------------------------------------------
    # The (tb, f_in) activation block is lane-padded to 128 lanes in VMEM, so a
    # row costs 128*itemsize bytes, not f_in*itemsize.  Budget ~8 MiB per
    # buffer: double-buffered that stays well under the 32 MiB scoped default
    # on every generation (incl. v7x's 64 MiB physical VMEM).
    itemsize = jnp.dtype(x.dtype).itemsize
    per_row_vmem = 128 * itemsize
    vmem_budget = 8 * 1024 * 1024
    max_tb = max(128, (vmem_budget // per_row_vmem) // 128 * 128)

    if batch <= max_tb:
        tb = batch                                    # one step (v5e/v6e: 1 TC)
    else:
        # >= 2 even "parallel" steps (v7x megacore); keep tb a multiple of 128
        # so the tiled out_spec obeys the (8,128) rule.
        half = -(-batch // 2)
        tb = min(max_tb, ((half + 127) // 128) * 128)
    grid = (-(-batch // tb),)

    cost = pl.CostEstimate(
        flops=2 * batch * f_in * f_out,
        transcendentals=0,
        bytes_accessed=batch * (f_in * itemsize + f_out * itemsize)
        + f_out * (f_in * jnp.dtype(weight.dtype).itemsize + 4),
    )

    return pl.pallas_call(
        _linear_kernel,
        out_shape=jax.ShapeDtypeStruct((batch, f_out), x.dtype),
        grid=grid,
        in_specs=[
            pl.BlockSpec((tb, f_in), lambda i: (i, 0)),          # activations
            pl.BlockSpec((f_out, f_in), lambda i: (0, 0)),       # full weight
            pl.BlockSpec(memory_space=pltpu.MemorySpace.SMEM),   # bias scalars
        ],
        out_specs=pl.BlockSpec((tb, f_out), lambda i: (i, 0)),   # (batch, 2)
        compiler_params=pltpu.CompilerParams(
            dimension_semantics=("parallel",)),
        cost_estimate=cost,
    )(x, weight, bias.astype(jnp.float32))


if __name__ == "__main__":
    NUM_QUBITS = 4
    hidden_size = 2 ** NUM_QUBITS              # 16
    in_features = hidden_size * 2              # 32
    out_features = 2
    batch = 8

    key = jax.random.PRNGKey(0)
    kx, kw, kb = jax.random.split(key, 3)

    # PyTorch nn.Linear default init: U(-1/sqrt(fan_in), +1/sqrt(fan_in)).
    bound = 1.0 / math.sqrt(in_features)
    weight = jax.random.uniform(kw, (out_features, in_features),
                                dtype=jnp.float32, minval=-bound, maxval=bound)
    bias = jax.random.uniform(kb, (out_features,),
                              dtype=jnp.float32, minval=-bound, maxval=bound)

    # The module indexes res[0]; emulate a tuple whose first element is the
    # (batch, 32) feature matrix.
    x = jax.random.normal(kx, (batch, in_features), dtype=jnp.float32)
    res = (x,)

    out = jax.block_until_ready(classifier_forward(res, weight, bias))

    # Reference check against plain JAX.
    ref = x @ weight.T + bias
    assert out.shape == (batch, out_features)
    assert jnp.allclose(out, ref, atol=1e-5, rtol=1e-5)

    print("KERNEL_OK")
</pallas_src>

<mosaic_0001>
module attributes {stable_mosaic.version = 11 : i64} {
  func.func @_linear_kernel(%arg0: i32, %arg1: memref<8x32xf32, #tpu.memory_space<vmem>>, %arg2: memref<2x32xf32, #tpu.memory_space<vmem>>, %arg3: memref<2xf32, #tpu.memory_space<smem>>, %arg4: memref<8x2xf32, #tpu.memory_space<vmem>>) attributes {dimension_semantics = [#tpu.dimension_semantics<parallel>], iteration_bounds = array<i64: 1>, scalar_prefetch = 0 : i64, scratch_operands = 0 : i64, tpu.core_type = #tpu.core_type<tc>, window_params = [{transform_indices = @transform_0, window_bounds = array<i64: 8, 32>}, {pipeline_mode = #tpu.pipeline_mode<synchronous>, transform_indices = @transform_1, window_bounds = array<i64: 2, 32>}, {transform_indices = @transform_2, window_bounds = array<i64: 2>}, {transform_indices = @transform_3, window_bounds = array<i64: 8, 2>}]} {
    %c0 = arith.constant 0 : index
    %c0_0 = arith.constant 0 : index
    %0 = vector.load %arg1[%c0, %c0_0] : memref<8x32xf32, #tpu.memory_space<vmem>>, vector<8x32xf32>
    %c0_1 = arith.constant 0 : index
    %c0_2 = arith.constant 0 : index
    %1 = vector.load %arg2[%c0_1, %c0_2] : memref<2x32xf32, #tpu.memory_space<vmem>>, vector<2x32xf32>
    %cst = arith.constant dense<0.000000e+00> : vector<8x2xf32>
    %2 = tpu.matmul %0, %1, %cst {dimension_numbers = #tpu.dot_dimension_numbers<[1], [1], [0], [0], [0, 0, 1, 0], [], []>} : vector<8x32xf32>, vector<2x32xf32>, vector<8x2xf32> -> vector<8x2xf32>
    %3 = tpu.iota {dimensions = array<i32: 1>} : vector<8x2xi32>
    %cst_3 = arith.constant 0.000000e+00 : f32
    %4 = vector.broadcast %cst_3 : f32 to vector<8x2xf32>
    %c0_i32 = arith.constant 0 : i32
    %5 = vector.broadcast %c0_i32 : i32 to vector<8x2xi32>
    %6 = arith.cmpi eq, %3, %5 : vector<8x2xi32>
    %c0_4 = arith.constant 0 : index
    %7 = memref.load %arg3[%c0_4] : memref<2xf32, #tpu.memory_space<smem>>
    %8 = vector.broadcast %7 : f32 to vector<8x2xf32>
    %9 = arith.select %6, %8, %4 : vector<8x2xi1>, vector<8x2xf32>
    %c1_i32 = arith.constant 1 : i32
    %10 = vector.broadcast %c1_i32 : i32 to vector<8x2xi32>
    %11 = arith.cmpi eq, %3, %10 : vector<8x2xi32>
    %c1 = arith.constant 1 : index
    %12 = memref.load %arg3[%c1] : memref<2xf32, #tpu.memory_space<smem>>
    %13 = vector.broadcast %12 : f32 to vector<8x2xf32>
    %14 = arith.select %11, %13, %9 : vector<8x2xi1>, vector<8x2xf32>
    %15 = arith.addf %2, %14 : vector<8x2xf32>
    %c0_5 = arith.constant 0 : index
    %c0_6 = arith.constant 0 : index
    %16 = vector.load %arg4[%c0_5, %c0_6] : memref<8x2xf32, #tpu.memory_space<vmem>>, vector<8x2xf32>
    tpu.vector_store %arg4[%c0_5, %c0_6], %15 {strides = array<i32>} : memref<8x2xf32, #tpu.memory_space<vmem>>, vector<8x2xf32>,
    return
  }
  func.func @transform_0(%arg0: i32) -> (i32, i32) {
    %c0_i32 = arith.constant 0 : i32
    %c0_i32_0 = arith.constant 0 : i32
    return %arg0, %c0_i32 : i32, i32
  }
  func.func @transform_1(%arg0: i32) -> (i32, i32) {
    %c0_i32 = arith.constant 0 : i32
    %c0_i32_0 = arith.constant 0 : i32
    %c0_i32_1 = arith.constant 0 : i32
    return %c0_i32, %c0_i32_0 : i32, i32
  }
  func.func @transform_2(%arg0: i32) -> i32 {
    %c0_i32 = arith.constant 0 : i32
    %c0_i32_0 = arith.constant 0 : i32
    return %c0_i32 : i32
  }
  func.func @transform_3(%arg0: i32) -> (i32, i32) {
    %c0_i32 = arith.constant 0 : i32
    %c0_i32_0 = arith.constant 0 : i32
    return %arg0, %c0_i32 : i32, i32
  }
}

</mosaic_0001>

<bundles_post_ra>
// kernel: tpu_custom_call.1
= control target key start
LH: loop header
LB: loop body
LE: loop exit
PB: predicated region body
PF: predicated region fallthrough
CT: control target
= control target key end

     0   :  { %8 = vsyncpa [#allocation3], 0  ;;  %s210_s0 = inlined_call_operand.hbm [shape: f32[8,32], index: 0, kind: input, shape index: {}]   ;;  %s211_s1 = inlined_call_operand.hbm [shape: f32[2,32], index: 1, kind: input, shape index: {}]   ;;  %s212_s2 = inlined_call_operand.vmem [shape: f32[2], index: 2, kind: input, shape index: {}]   ;;  %s213_s3 = inlined_call_operand.vmem [shape: f32[8,2], index: 3, kind: output, shape index: {}]  }
   0x1   :  { %9 = vsyncpa [#allocation6], 0  ;;  %s16_s14 = sshll.u32 %s210_s0, 4  ;;  %s17_s14 = int_to_ptr.hbm [resolvable:$true] %s16_s14 }
   0x2   :  { %10 = vsyncpa [#allocation4], 0  ;;  %s175_s15 = smov [#allocation2]   ;;  %s27_s19 = sshll.u32 %s211_s1, 4  ;;  %s28_s19 = int_to_ptr.hbm [resolvable:$true] %s27_s19 }
   0x3   :  { %s18_s16 = sshll.u32 %s175_s15, 4  ;;  %s176_s20 = smov [#allocation5]   ;;  %s19_s16 = int_to_ptr.vmem [resolvable:$true] %s18_s16 }
   0x4   :  { %21 = dma.hbm_to_vmem [thread:$0]  %s17_s14, 128, %s19_s16, [#allocation3]  }
   0x5   :  { %s29_s21 = sshll.u32 %s176_s20, 4  ;;  %s38_s24 = sshll.u32 %s212_s2, 4  ;;  %s30_s21 = int_to_ptr.vmem [resolvable:$true] %s29_s21  ;;  %s39_s24 = int_to_ptr.vmem [resolvable:$true] %s38_s24 }
   0x6   :  { %32 = dma.hbm_to_vmem [thread:$0]  %s28_s19, 32, %s30_s21, [#allocation6]  }
   0x7   :  { %s177_s0 = smov [#allocation7]  }
   0x8   :  { %41 = dma.vmem_to_smem %s39_s24, 16, %s177_s0, [#allocation4]  }
   0x9   :  { %169 = dma.done.wait [#allocation3], 128  }
   0xa   :  { %170 = vsyncadd [#allocation3], 4294967168 }
   0xb   :  { %171 = dma.done.wait [#allocation6], 32  }
   0xc   :  { %172 = vsyncadd [#allocation6], 4294967264 }
   0xd   :  { %173 = dma.done.wait [#allocation4], 16  }
   0xe   :  { %174 = vsyncadd [#allocation4], 4294967280 }
   0xf   :  { %54 = sfence }
  0x10   :  { %v56_v0 = vld [vmem:[#allocation5] sm:$0x3]  ;;  %vm67_vm0 = vcmask 261120   ;;  %v55_v1 = vld [vmem:[#allocation2] sm:$0xff]  ;;  %v57_v2 = vlaneseq  ;;  %s60_s1 = sld [smem:[#allocation7]]  ;;  %vm94_vm3 = vcmask 15360  }
  0x11   :  { %104 = vmatpush.xpose.msk.msra.mxu0 %vm67_vm0, %v56_v0  ;;  %s103_s2 = sld [smem:[#allocation7 + $0x1]] }
  0x12   :  { %v58_v3 = vand.u32 127, %v57_v2 }
  0x14   :  { %105 = vmatmul.msk.f32.vlgmr.msra.gmra.mxu0 %vm67_vm0, %v55_v1  ;;  %vm59_vm1 = vcmp.eq.s32.totalorder %v58_v3, 0  ;;  %vm63_vm2 = vcmp.eq.s32.totalorder %v58_v3, 1 }
  0x16   :  { %v61_v4 = vstv %s60_s1 }
  0x17   :  { %v62_v5 = vsel %vm59_vm1, %v61_v4, 0.0  ;;  %v65_v6 = vstv %s103_s2 }
  0x18   :  { %v66_v7 = vsel %vm63_vm2, %v65_v6, %v62_v5 }
  0x91   :  { %v91_v8 = vpop.f32.mrf.mxu0 }
  0x92   :  { %v92_v9 = vadd.f32 %v91_v8, %v66_v7 }
  0x94   :  { %95 = vst.msk [vmem:[%s213_s3] sm:$0xff] %vm94_vm3, %v92_v9 }
  0x95   :  { %100 = vsyncpa [#allocation3], 1 }
  0x96   :  { %101 = vsyncpa [#allocation6], 1 }
  0x97   :  { %102 = vsyncpa [#allocation4], 1 }

</bundles_post_ra>
